<compile_context>
chip_gen: v6e
topology: v6e:2x2x1
jax: 0.10.0
libtpu: 0.0.40
codegen_flags: <defaults>
</compile_context>

<pallas_src>
import functools

import jax
import jax.numpy as jnp
from jax.experimental import pallas as pl
from jax.experimental.pallas import tpu as pltpu


def mlp_kernel(x_ref, w1_ref, b1_ref, w2_ref, b2_ref, o_ref):
    # First linear: (TB, D) @ (D, H) + (1, H), then ReLU (VPU, fused on the tile).
    h = jnp.dot(x_ref[...], w1_ref[...], preferred_element_type=jnp.float32)
    h = jnp.maximum(h + b1_ref[...], 0.0)
    # Second linear into the lane-dense padded action dim: (TB, H) @ (H, A_pad).
    out = jnp.dot(h, w2_ref[...], preferred_element_type=jnp.float32) + b2_ref[...]
    o_ref[...] = out.astype(o_ref.dtype)


def _round_up(v, m):
    return ((v + m - 1) // m) * m


@functools.partial(jax.jit, static_argnames=("block_b",))
def mlp_forward(x, w1, b1, w2, b2, *, block_b=128):
    """Forward pass of Linear(obs_dim,128) -> ReLU -> Linear(128,num_actions)."""
    B, D = x.shape
    H = w1.shape[1]
    A = w2.shape[1]

    # Lane-dense output: pad the action dim up to a multiple of 128 (zeros, so
    # values in the valid columns are unchanged).
    A_pad = max(128, _round_up(A, 128))
    if A_pad != A:
        w2 = jnp.pad(w2, ((0, 0), (0, A_pad - A)))
        b2 = jnp.pad(b2, ((0, 0), (0, A_pad - A)))

    # Effective batch tile: multiple of 8 sublanes, no larger than needed, so
    # small batches don't get padded all the way to a 128-row matmul.
    block_b_eff = min(block_b, _round_up(B, 8))
    B_pad = _round_up(B, block_b_eff)
    if B_pad != B:
        x = jnp.pad(x, ((0, B_pad - B), (0, 0)))

    grid = (B_pad // block_b_eff,)

    cost = pl.CostEstimate(
        flops=2 * B_pad * (D * H + H * A_pad),
        transcendentals=0,
        bytes_accessed=4 * (B_pad * D + D * H + H + H * A_pad + A_pad + B_pad * A_pad),
    )

    out = pl.pallas_call(
        mlp_kernel,
        out_shape=jax.ShapeDtypeStruct((B_pad, A_pad), x.dtype),
        grid_spec=pltpu.PrefetchScalarGridSpec(
            num_scalar_prefetch=0,
            grid=grid,
            in_specs=[
                # x streams per B tile; weights/biases are resident (constant index).
                pl.BlockSpec((block_b_eff, D), lambda i: (i, 0)),
                pl.BlockSpec((D, H), lambda i: (0, 0)),
                pl.BlockSpec((1, H), lambda i: (0, 0)),
                pl.BlockSpec((H, A_pad), lambda i: (0, 0)),
                pl.BlockSpec((1, A_pad), lambda i: (0, 0)),
            ],
            out_specs=pl.BlockSpec((block_b_eff, A_pad), lambda i: (i, 0)),
        ),
        compiler_params=pltpu.CompilerParams(
            dimension_semantics=("parallel",),
        ),
        cost_estimate=cost,
    )(x, w1, b1, w2, b2)

    # Strip batch / action-dim padding outside the kernel.
    return out[:B, :A]


def init_params(key, obs_dim, hidden, num_actions):
    """Deterministic init mimicking PyTorch Linear default (uniform +/- 1/sqrt(fan_in))."""
    k1, k2, k3, k4 = jax.random.split(key, 4)
    lim1 = 1.0 / jnp.sqrt(obs_dim)
    lim2 = 1.0 / jnp.sqrt(hidden)
    w1 = jax.random.uniform(k1, (obs_dim, hidden), jnp.float32, -lim1, lim1)
    b1 = jax.random.uniform(k2, (1, hidden), jnp.float32, -lim1, lim1)
    w2 = jax.random.uniform(k3, (hidden, num_actions), jnp.float32, -lim2, lim2)
    b2 = jax.random.uniform(k4, (1, num_actions), jnp.float32, -lim2, lim2)
    return w1, b1, w2, b2


def _ref_forward(x, w1, b1, w2, b2):
    return jnp.maximum(x @ w1 + b1, 0.0) @ w2 + b2


if __name__ == "__main__":
    # TODO(synk): the PyTorch module also bundles an Adam optimizer; only the
    # forward pass is implemented here.
    obs_dim = 32
    hidden = 128
    num_actions = 4

    key = jax.random.PRNGKey(0)
    kx, kp = jax.random.split(key)
    w1, b1, w2, b2 = init_params(kp, obs_dim, hidden, num_actions)

    # Small batch (typical single-env policy eval) — uses a reduced B tile.
    batch = 8
    x = jax.random.normal(kx, (batch, obs_dim), jnp.float32)
    out = mlp_forward(x, w1, b1, w2, b2, block_b=128)
    jax.block_until_ready(out)
    ref = _ref_forward(x, w1, b1, w2, b2)
    assert out.shape == (batch, num_actions)
    assert jnp.allclose(out, ref, atol=1e-5, rtol=1e-5)

    # Larger batch that exercises multiple grid steps (2 x 128-row tiles).
    x_big = jax.random.normal(jax.random.PRNGKey(1), (256, obs_dim), jnp.float32)
    out_big = mlp_forward(x_big, w1, b1, w2, b2, block_b=128)
    jax.block_until_ready(out_big)
    ref_big = _ref_forward(x_big, w1, b1, w2, b2)
    assert out_big.shape == (256, num_actions)
    assert jnp.allclose(out_big, ref_big, atol=1e-5, rtol=1e-5)

    # Non-multiple-of-8 batch that needs row padding.
    x_odd = x_big[:37]
    out_odd = mlp_forward(x_odd, w1, b1, w2, b2, block_b=128)
    jax.block_until_ready(out_odd)
    ref_odd = _ref_forward(x_odd, w1, b1, w2, b2)
    assert out_odd.shape == (37, num_actions)
    assert jnp.allclose(out_odd, ref_odd, atol=1e-5, rtol=1e-5)

    print("KERNEL_OK")
</pallas_src>

<mosaic_0001>
module attributes {stable_mosaic.version = 11 : i64} {
  func.func @mlp_kernel(%arg0: i32, %arg1: memref<8x32xf32, #tpu.memory_space<vmem>>, %arg2: memref<32x128xf32, #tpu.memory_space<vmem>>, %arg3: memref<1x128xf32, #tpu.memory_space<vmem>>, %arg4: memref<128x128xf32, #tpu.memory_space<vmem>>, %arg5: memref<1x128xf32, #tpu.memory_space<vmem>>, %arg6: memref<8x128xf32, #tpu.memory_space<vmem>>) attributes {dimension_semantics = [#tpu.dimension_semantics<parallel>], iteration_bounds = array<i64: 1>, scalar_prefetch = 0 : i64, scratch_operands = 0 : i64, tpu.core_type = #tpu.core_type<tc>, window_params = [{transform_indices = @transform_0, window_bounds = array<i64: 8, 32>}, {pipeline_mode = #tpu.pipeline_mode<synchronous>, transform_indices = @transform_1, window_bounds = array<i64: 32, 128>}, {pipeline_mode = #tpu.pipeline_mode<synchronous>, transform_indices = @transform_2, window_bounds = array<i64: 1, 128>}, {pipeline_mode = #tpu.pipeline_mode<synchronous>, transform_indices = @transform_3, window_bounds = array<i64: 128, 128>}, {pipeline_mode = #tpu.pipeline_mode<synchronous>, transform_indices = @transform_4, window_bounds = array<i64: 1, 128>}, {transform_indices = @transform_5, window_bounds = array<i64: 8, 128>}]} {
    %c0 = arith.constant 0 : index
    %c0_0 = arith.constant 0 : index
    %0 = vector.load %arg1[%c0, %c0_0] : memref<8x32xf32, #tpu.memory_space<vmem>>, vector<8x32xf32>
    %c0_1 = arith.constant 0 : index
    %c0_2 = arith.constant 0 : index
    %1 = vector.load %arg2[%c0_1, %c0_2] : memref<32x128xf32, #tpu.memory_space<vmem>>, vector<32x128xf32>
    %cst = arith.constant dense<0.000000e+00> : vector<8x128xf32>
    %2 = tpu.matmul %0, %1, %cst {dimension_numbers = #tpu.dot_dimension_numbers<[1], [0], [0], [1], [0, 0, 1, 1], [], []>} : vector<8x32xf32>, vector<32x128xf32>, vector<8x128xf32> -> vector<8x128xf32>
    %c0_3 = arith.constant 0 : index
    %c0_4 = arith.constant 0 : index
    %3 = vector.load %arg3[%c0_3, %c0_4] : memref<1x128xf32, #tpu.memory_space<vmem>>, vector<1x128xf32>
    %4 = vector.broadcast %3 : vector<1x128xf32> to vector<8x128xf32>
    %5 = arith.addf %2, %4 : vector<8x128xf32>
    %cst_5 = arith.constant 0.000000e+00 : f32
    %6 = vector.broadcast %cst_5 : f32 to vector<8x128xf32>
    %7 = arith.maximumf %5, %6 : vector<8x128xf32>
    %c0_6 = arith.constant 0 : index
    %c0_7 = arith.constant 0 : index
    %8 = vector.load %arg4[%c0_6, %c0_7] : memref<128x128xf32, #tpu.memory_space<vmem>>, vector<128x128xf32>
    %cst_8 = arith.constant dense<0.000000e+00> : vector<8x128xf32>
    %9 = tpu.matmul %7, %8, %cst_8 {dimension_numbers = #tpu.dot_dimension_numbers<[1], [0], [0], [1], [0, 0, 1, 1], [], []>} : vector<8x128xf32>, vector<128x128xf32>, vector<8x128xf32> -> vector<8x128xf32>
    %c0_9 = arith.constant 0 : index
    %c0_10 = arith.constant 0 : index
    %10 = vector.load %arg5[%c0_9, %c0_10] : memref<1x128xf32, #tpu.memory_space<vmem>>, vector<1x128xf32>
    %11 = vector.broadcast %10 : vector<1x128xf32> to vector<8x128xf32>
    %12 = arith.addf %9, %11 : vector<8x128xf32>
    %c0_11 = arith.constant 0 : index
    %c0_12 = arith.constant 0 : index
    %13 = vector.load %arg6[%c0_11, %c0_12] : memref<8x128xf32, #tpu.memory_space<vmem>>, vector<8x128xf32>
    tpu.vector_store %arg6[%c0_11, %c0_12], %12 {strides = array<i32>} : memref<8x128xf32, #tpu.memory_space<vmem>>, vector<8x128xf32>,
    return
  }
  func.func @transform_0(%arg0: i32) -> (i32, i32) {
    %c0_i32 = arith.constant 0 : i32
    %c0_i32_0 = arith.constant 0 : i32
    return %arg0, %c0_i32 : i32, i32
  }
  func.func @transform_1(%arg0: i32) -> (i32, i32) {
    %c0_i32 = arith.constant 0 : i32
    %c0_i32_0 = arith.constant 0 : i32
    %c0_i32_1 = arith.constant 0 : i32
    return %c0_i32, %c0_i32_0 : i32, i32
  }
  func.func @transform_2(%arg0: i32) -> (i32, i32) {
    %c0_i32 = arith.constant 0 : i32
    %c0_i32_0 = arith.constant 0 : i32
    %c0_i32_1 = arith.constant 0 : i32
    return %c0_i32, %c0_i32_0 : i32, i32
  }
  func.func @transform_3(%arg0: i32) -> (i32, i32) {
    %c0_i32 = arith.constant 0 : i32
    %c0_i32_0 = arith.constant 0 : i32
    %c0_i32_1 = arith.constant 0 : i32
    return %c0_i32, %c0_i32_0 : i32, i32
  }
  func.func @transform_4(%arg0: i32) -> (i32, i32) {
    %c0_i32 = arith.constant 0 : i32
    %c0_i32_0 = arith.constant 0 : i32
    %c0_i32_1 = arith.constant 0 : i32
    return %c0_i32, %c0_i32_0 : i32, i32
  }
  func.func @transform_5(%arg0: i32) -> (i32, i32) {
    %c0_i32 = arith.constant 0 : i32
    %c0_i32_0 = arith.constant 0 : i32
    return %arg0, %c0_i32 : i32, i32
  }
}

</mosaic_0001>

<bundles_post_ra>
// kernel: mlp_forward.1
= control target key start
LH: loop header
LB: loop body
LE: loop exit
PB: predicated region body
PF: predicated region fallthrough
CT: control target
= control target key end

     0   :  { %v278_v0 = vmov 0.0   ;;  %vm279_vm0 = vmmov 0   ;;  %vm32_vm1 = vcmask 261120   ;;  %s406_s1 = inlined_call_operand.vmem [shape: f32[32,128], index: 1, kind: input, shape index: {}]   ;;  %s407_s3 = inlined_call_operand.vmem [shape: f32[128,128], index: 3, kind: input, shape index: {}]   ;;  %s408_s0 = inlined_call_operand.vmem [shape: f32[8,32], index: 0, kind: input, shape index: {}]   ;;  %s409_s2 = inlined_call_operand.vmem [shape: f32[1,128], index: 2, kind: input, shape index: {}]   ;;  %s410_s4 = inlined_call_operand.vmem [shape: f32[1,128], index: 4, kind: input, shape index: {}]   ;;  %s411_s5 = inlined_call_operand.vmem [shape: f32[8,128], index: 5, kind: output, shape index: {}]  }
   0x1   :  { %230 = vmatprep.subr.mxu0 %v278_v0  ;;  %v24_v1 = vld [vmem:[%s406_s1 + $0x18] sm:$0xff]  ;;  %v23_v2 = vld [vmem:[%s406_s1 + $0x10] sm:$0xff]  ;;  %238 = vmatprep.mubr.msk.f32.mxu0 %vm279_vm0, %v278_v0  ;;  %v22_v4 = vld [vmem:[%s406_s1 + $0x8] sm:$0xff] }
   0x2   :  { %231 = vmatpush3.msra.mxu0 %v24_v1  ;;  %241 = vmatprep.subr.mxu1 %v278_v0  ;;  %v122_v3 = vld [vmem:[%s407_s3 + $0x78] sm:$0xff]  ;;  %v121_v5 = vld [vmem:[%s407_s3 + $0x70] sm:$0xff]  ;;  %v120_v6 = vld [vmem:[%s407_s3 + $0x68] sm:$0xff] }
   0x3   :  { %232 = vmatprep.subr.mxu0 %v278_v0  ;;  %242 = vmatpush3.msra.mxu1 %v122_v3  ;;  %v21_v7 = vld [vmem:[%s406_s1] sm:$0xff]  ;;  %v118_v10 = vld [vmem:[%s407_s3 + $0x58] sm:$0xff]  ;;  %v117_v11 = vld [vmem:[%s407_s3 + $0x50] sm:$0xff] }
   0x4   :  { %233 = vmatpush3.msra.mxu0 %v23_v2  ;;  %243 = vmatprep.subr.mxu1 %v278_v0  ;;  %v20_v8 = vld [vmem:[%s408_s0] sm:$0xff]  ;;  %v116_v12 = vld [vmem:[%s407_s3 + $0x48] sm:$0xff]  ;;  %v114_v14 = vld [vmem:[%s407_s3 + $0x38] sm:$0xff] }
   0x5   :  { %234 = vmatprep.subr.mxu0 %v278_v0  ;;  %244 = vmatpush3.msra.mxu1 %v121_v5  ;;  %v119_v9 = vld [vmem:[%s407_s3 + $0x60] sm:$0xff]  ;;  %v113_v15 = vld [vmem:[%s407_s3 + $0x30] sm:$0xff]  ;;  %v112_v16 = vld [vmem:[%s407_s3 + $0x28] sm:$0xff] }
   0x6   :  { %235 = vmatpush3.msra.mxu0 %v22_v4  ;;  %245 = vmatprep.subr.mxu1 %v278_v0  ;;  %v115_v13 = vld [vmem:[%s407_s3 + $0x40] sm:$0xff]  ;;  %v110_v18 = vld [vmem:[%s407_s3 + $0x18] sm:$0xff]  ;;  %v109_v19 = vld [vmem:[%s407_s3 + $0x10] sm:$0xff] }
   0x7   :  { %236 = vmatprep.subr.mxu0 %v278_v0  ;;  %246 = vmatpush3.msra.mxu1 %v120_v6  ;;  %v111_v17 = vld [vmem:[%s407_s3 + $0x20] sm:$0xff]  ;;  %v108_v20 = vld [vmem:[%s407_s3 + $0x8] sm:$0xff] }
   0x8   :  { %237 = vmatpush3.msra.mxu0 %v21_v7  ;;  %247 = vmatprep.subr.mxu1 %v278_v0  ;;  %v107_v21 = vld [vmem:[%s407_s3] sm:$0xff] }
   0x9   :  { %239 = vmatmul.mubr.msk.f32.vlgmr.msra.gmra.mxu0 %vm32_vm1, %v20_v8  ;;  %248 = vmatpush3.msra.mxu1 %v119_v9  ;;  %v205_v22 = vld [vmem:[%s409_s2] ss:$0 sm:$0xff] }
   0xa   :  { %249 = vmatprep.subr.mxu1 %v278_v0  ;;  %273 = vmatprep.mubr.msk.f32.mxu1 %vm279_vm0, %v278_v0  ;;  %v207_v27 = vld [vmem:[%s410_s4] ss:$0 sm:$0xff] }
   0xb   :  { %250 = vmatpush3.msra.mxu1 %v118_v10 }
   0xc   :  { %251 = vmatprep.subr.mxu1 %v278_v0 }
   0xd   :  { %252 = vmatpush3.msra.mxu1 %v117_v11 }
   0xe   :  { %253 = vmatprep.subr.mxu1 %v278_v0 }
   0xf   :  { %254 = vmatpush3.msra.mxu1 %v116_v12 }
  0x10   :  { %255 = vmatprep.subr.mxu1 %v278_v0 }
  0x11   :  { %256 = vmatpush3.msra.mxu1 %v115_v13 }
  0x12   :  { %257 = vmatprep.subr.mxu1 %v278_v0 }
  0x13   :  { %258 = vmatpush3.msra.mxu1 %v114_v14 }
  0x14   :  { %259 = vmatprep.subr.mxu1 %v278_v0 }
  0x15   :  { %260 = vmatpush3.msra.mxu1 %v113_v15 }
  0x16   :  { %261 = vmatprep.subr.mxu1 %v278_v0 }
  0x17   :  { %262 = vmatpush3.msra.mxu1 %v112_v16 }
  0x18   :  { %263 = vmatprep.subr.mxu1 %v278_v0 }
  0x19   :  { %264 = vmatpush3.msra.mxu1 %v111_v17 }
  0x1a   :  { %265 = vmatprep.subr.mxu1 %v278_v0 }
  0x1b   :  { %266 = vmatpush3.msra.mxu1 %v110_v18 }
  0x1c   :  { %267 = vmatprep.subr.mxu1 %v278_v0 }
  0x1d   :  { %268 = vmatpush3.msra.mxu1 %v109_v19 }
  0x1e   :  { %269 = vmatprep.subr.mxu1 %v278_v0 }
  0x1f   :  { %270 = vmatpush3.msra.mxu1 %v108_v20 }
  0x20   :  { %271 = vmatprep.subr.mxu1 %v278_v0 }
  0x21   :  { %272 = vmatpush3.msra.mxu1 %v107_v21 }
  0xc9   :  { %v102_v23 = vpop.f32.mrf.mxu0 }
  0xca   :  { %v103_v24 = vadd.f32 %v205_v22, %v102_v23 }
  0xcb   :  { %v240_v25 = vpop.f32.mrf.mxu0 }
  0xcc   :  { %v106_v26 = vmax.f32 %v103_v24, 0.0 }
  0xce   :  { %274 = vmatmul.mubr.f32.vlgmr.msra.gmra.mxu1 %v106_v26 }
 0x18e   :  { %v196_v28 = vpop.f32.mrf.mxu1 }
 0x18f   :  { %v197_v29 = vadd.f32 %v207_v27, %v196_v28 }
 0x190   :  { %v275_v30 = vpop.f32.mrf.mxu1 }
 0x191   :  { %200 = vst [vmem:[%s411_s5] sm:$0xff] %v197_v29 }

</bundles_post_ra>
